<compile_context>
chip_gen: v6e
topology: v6e:2x2x1
jax: 0.10.0
libtpu: 0.0.40
codegen_flags: <defaults>
</compile_context>

<pallas_src>
import jax
import jax.numpy as jnp
from jax import lax
from jax.experimental import pallas as pl
from jax.experimental.pallas import tpu as pltpu

# Small shapes consistent with the module (n_dims=C, heads=4, width/height configurable).
B = 2          # batch
C = 32         # n_dims (channels)
Wd = 8         # spatial width
Hd = 8         # spatial height
HEADS = 4      # module default


def mhsa_kernel(x_ref, w_ref, b_ref, r_ref, o_ref):
    # One batch element per grid step. All shapes/constants derived from the refs.
    #   x_ref : (C, S)      channel-major activations (spatial on lanes)
    #   w_ref : (3C, C)     fused [Wq; Wk; Wv] (channel-major, no transpose needed)
    #   b_ref : (3C, 1)     fused bias column
    #   r_ref : (H, DH, S)  relative-position table rel_h + rel_w (head-major)
    #   o_ref : (C, S)      output, channel-major
    c, s = x_ref.shape
    heads, dh, _ = r_ref.shape

    x = x_ref[...]
    w = w_ref[...]
    bias = b_ref[...]
    r = r_ref[...]

    # Fused q/k/v projection: one (3C, C) @ (C, S) MXU matmul + broadcast bias add.
    qkv = jnp.dot(w, x, preferred_element_type=jnp.float32) + bias          # (3C, S)

    # Head split = tile-aligned sublane reshape (offsets 0/C/2C are multiples of 8).
    q = qkv[0 * c:1 * c, :].reshape(heads, dh, s)                            # (H, DH, S)
    k = qkv[1 * c:2 * c, :].reshape(heads, dh, s)
    v = qkv[2 * c:3 * c, :].reshape(heads, dh, s)

    # Fused energy: energy[h,i,j] = sum_d q[h,d,i]k[h,d,j] + sum_d r[h,d,i]q[h,d,j]
    # (single head-batched matmul with contraction dim 2*DH; no cc+cp add).
    lhs = jnp.concatenate([q, r], axis=1)                                    # (H, 2*DH, S)
    rhs = jnp.concatenate([k, q], axis=1)                                    # (H, 2*DH, S)
    energy = lax.dot_general(
        lhs, rhs,
        dimension_numbers=(((1,), (1,)), ((0,), (0,))),
        preferred_element_type=jnp.float32)                                  # (H, S, S)

    # Softmax over the key axis (no scaling — faithful to the module).
    m = jnp.max(energy, axis=-1, keepdims=True)
    p = jnp.exp(energy - m)
    denom = jnp.sum(p, axis=-1, keepdims=True)
    attn = p * pl.reciprocal(denom, approx=True)                             # (H, S, S)

    # out[h,d,i] = sum_j v[h,d,j] * attn[h,i,j]   (head-batched matmul)
    out = lax.dot_general(
        v, attn,
        dimension_numbers=(((2,), (2,)), ((0,), (0,))),
        preferred_element_type=jnp.float32)                                  # (H, DH, S)

    # Single dense channel-major store.
    o_ref[...] = out.reshape(c, s).astype(o_ref.dtype)


def prepare_mhsa_params(wq, bq, wk, bk, wv, bv, rel_h, rel_w):
    """Parameter-only layout prep. Call ONCE at init time — hoisted out of the forward path."""
    heads, dh = rel_h.shape[1], rel_h.shape[2]
    c = heads * dh
    w_all = jnp.concatenate([wq, wk, wv], axis=0)                            # (3C, C)
    b_all = jnp.concatenate([bq, bk, bv]).reshape(3 * c, 1)                  # (3C, 1)
    r = (rel_h + rel_w).reshape(heads, dh, -1)                               # (H, DH, S)
    return w_all, b_all, r


def mhsa_pallas(x, w_all, b_all, r):
    """x: (B, C, W, H) f32; fused params from prepare_mhsa_params. Returns (B, C, W, H)."""
    bn, cn, wn, hn = x.shape
    heads, dh, sn = r.shape
    assert cn == heads * dh and sn == wn * hn and w_all.shape == (3 * cn, cn)

    x_flat = x.reshape(bn, cn, sn)                                           # pure reshape, no transpose

    out = pl.pallas_call(
        mhsa_kernel,
        out_shape=jax.ShapeDtypeStruct((bn, cn, sn), jnp.float32),
        grid=(bn,),                                                          # one batch element / step
        in_specs=[
            pl.BlockSpec((None, cn, sn), lambda b: (b, 0, 0)),               # x slab for this batch
            pl.BlockSpec((3 * cn, cn), lambda b: (0, 0)),                    # fused W (resident)
            pl.BlockSpec((3 * cn, 1), lambda b: (0, 0)),                     # fused bias (resident)
            pl.BlockSpec((heads, dh, sn), lambda b: (0, 0, 0)),              # rel-pos table (resident)
        ],
        out_specs=pl.BlockSpec((None, cn, sn), lambda b: (b, 0, 0)),
        compiler_params=pltpu.CompilerParams(
            dimension_semantics=("parallel",)),                              # 2 batches -> 2 TCs on v7x
    )(x_flat, w_all, b_all, r)

    return out.reshape(bn, cn, wn, hn)                                       # pure reshape back to NCHW


def mhsa_reference(x, wq, bq, wk, bk, wv, bv, rel_h, rel_w, heads=HEADS):
    """Plain-JAX transliteration of the PyTorch MHSA.forward."""
    bn, cn, wn, hn = x.shape

    def conv1x1(inp, w, bias):
        return jnp.einsum('oi,biwh->bowh', w, inp) + bias[None, :, None, None]

    q = conv1x1(x, wq, bq).reshape(bn, heads, cn // heads, -1)
    k = conv1x1(x, wk, bk).reshape(bn, heads, cn // heads, -1)
    v = conv1x1(x, wv, bv).reshape(bn, heads, cn // heads, -1)

    content_content = jnp.matmul(jnp.transpose(q, (0, 1, 3, 2)), k)
    cp_r = (rel_h + rel_w).reshape(1, heads, cn // heads, -1).transpose(0, 1, 3, 2)
    content_position = jnp.matmul(cp_r, q)
    energy = content_content + content_position
    attn = jax.nn.softmax(energy, axis=-1)
    out = jnp.matmul(v, jnp.transpose(attn, (0, 1, 3, 2)))
    return out.reshape(bn, cn, wn, hn)


if __name__ == "__main__":
    key = jax.random.PRNGKey(0)
    ks = jax.random.split(key, 9)
    scale = 0.1
    x = jax.random.normal(ks[0], (B, C, Wd, Hd), jnp.float32)
    wq = jax.random.normal(ks[1], (C, C), jnp.float32) * scale
    wk = jax.random.normal(ks[2], (C, C), jnp.float32) * scale
    wv = jax.random.normal(ks[3], (C, C), jnp.float32) * scale
    bq = jax.random.normal(ks[4], (C,), jnp.float32) * scale
    bk = jax.random.normal(ks[5], (C,), jnp.float32) * scale
    bv = jax.random.normal(ks[6], (C,), jnp.float32) * scale
    rel_h = jax.random.normal(ks[7], (1, HEADS, C // HEADS, 1, Hd), jnp.float32)
    rel_w = jax.random.normal(ks[8], (1, HEADS, C // HEADS, Wd, 1), jnp.float32)

    # Parameter prep happens once (init time), not per forward call.
    w_all, b_all, r_tab = prepare_mhsa_params(wq, bq, wk, bk, wv, bv, rel_h, rel_w)
    w_all, b_all, r_tab = jax.block_until_ready((w_all, b_all, r_tab))

    mhsa_forward = jax.jit(mhsa_pallas)
    out = mhsa_forward(x, w_all, b_all, r_tab)
    out = jax.block_until_ready(out)

    ref = mhsa_reference(x, wq, bq, wk, bk, wv, bv, rel_h, rel_w)
    assert out.shape == (B, C, Wd, Hd)
    max_err = float(jnp.max(jnp.abs(out - ref)))
    assert jnp.allclose(out, ref, atol=2e-3, rtol=2e-3), max_err
    print("KERNEL_OK")
</pallas_src>

<mosaic_0001>
module attributes {stable_mosaic.version = 11 : i64} {
  func.func @mhsa_kernel(%arg0: i32, %arg1: memref<1x32x64xf32, #tpu.memory_space<vmem>>, %arg2: memref<96x32xf32, #tpu.memory_space<vmem>>, %arg3: memref<96x1xf32, #tpu.memory_space<vmem>>, %arg4: memref<4x8x64xf32, #tpu.memory_space<vmem>>, %arg5: memref<1x32x64xf32, #tpu.memory_space<vmem>>) attributes {dimension_semantics = [#tpu.dimension_semantics<parallel>], iteration_bounds = array<i64: 2>, scalar_prefetch = 0 : i64, scratch_operands = 0 : i64, tpu.core_type = #tpu.core_type<tc>, window_params = [{transform_indices = @transform_0, window_bounds = array<i64: 1, 32, 64>}, {pipeline_mode = #tpu.pipeline_mode<synchronous>, transform_indices = @transform_1, window_bounds = array<i64: 96, 32>}, {pipeline_mode = #tpu.pipeline_mode<synchronous>, transform_indices = @transform_2, window_bounds = array<i64: 96, 1>}, {pipeline_mode = #tpu.pipeline_mode<synchronous>, transform_indices = @transform_3, window_bounds = array<i64: 4, 8, 64>}, {transform_indices = @transform_4, window_bounds = array<i64: 1, 32, 64>}]} {
    %c0 = arith.constant 0 : index
    %c0_0 = arith.constant 0 : index
    %c0_1 = arith.constant 0 : index
    %0 = vector.load %arg1[%c0, %c0_0, %c0_1] : memref<1x32x64xf32, #tpu.memory_space<vmem>>, vector<1x32x64xf32>
    %1 = vector.shape_cast %0 : vector<1x32x64xf32> to vector<32x64xf32>
    %c0_2 = arith.constant 0 : index
    %c0_3 = arith.constant 0 : index
    %2 = vector.load %arg2[%c0_2, %c0_3] : memref<96x32xf32, #tpu.memory_space<vmem>>, vector<96x32xf32>
    %c0_4 = arith.constant 0 : index
    %c0_5 = arith.constant 0 : index
    %3 = vector.load %arg3[%c0_4, %c0_5] : memref<96x1xf32, #tpu.memory_space<vmem>>, vector<96x1xf32>
    %c0_6 = arith.constant 0 : index
    %c0_7 = arith.constant 0 : index
    %c0_8 = arith.constant 0 : index
    %4 = vector.load %arg4[%c0_6, %c0_7, %c0_8] : memref<4x8x64xf32, #tpu.memory_space<vmem>>, vector<4x8x64xf32>
    %cst = arith.constant dense<0.000000e+00> : vector<96x64xf32>
    %5 = tpu.matmul %2, %1, %cst {dimension_numbers = #tpu.dot_dimension_numbers<[1], [0], [0], [1], [0, 0, 1, 1], [], []>} : vector<96x32xf32>, vector<32x64xf32>, vector<96x64xf32> -> vector<96x64xf32>
    %6 = vector.broadcast %3 : vector<96x1xf32> to vector<96x64xf32>
    %7 = arith.addf %5, %6 : vector<96x64xf32>
    %8 = vector.extract_strided_slice %7 {offsets = [0, 0], sizes = [32, 64], strides = [1, 1]} : vector<96x64xf32> to vector<32x64xf32>
    %9 = vector.shape_cast %8 : vector<32x64xf32> to vector<4x8x64xf32>
    %10 = vector.extract_strided_slice %7 {offsets = [32, 0], sizes = [32, 64], strides = [1, 1]} : vector<96x64xf32> to vector<32x64xf32>
    %11 = vector.shape_cast %10 : vector<32x64xf32> to vector<4x8x64xf32>
    %12 = vector.extract_strided_slice %7 {offsets = [64, 0], sizes = [32, 64], strides = [1, 1]} : vector<96x64xf32> to vector<32x64xf32>
    %13 = vector.shape_cast %12 : vector<32x64xf32> to vector<4x8x64xf32>
    %14 = tpu.concatenate %9, %4 in 1 : vector<4x8x64xf32>, vector<4x8x64xf32> -> vector<4x16x64xf32>
    %15 = tpu.concatenate %11, %9 in 1 : vector<4x8x64xf32>, vector<4x8x64xf32> -> vector<4x16x64xf32>
    %cst_9 = arith.constant dense<0.000000e+00> : vector<4x64x64xf32>
    %16 = tpu.matmul %14, %15, %cst_9 {dimension_numbers = #tpu.dot_dimension_numbers<[1], [1], [2], [2], [0, 0, 0, 2, 1, 2], [0], [0]>} : vector<4x16x64xf32>, vector<4x16x64xf32>, vector<4x64x64xf32> -> vector<4x64x64xf32>
    %cst_10 = arith.constant dense<0xFF800000> : vector<4x64xf32>
    %17 = vector.multi_reduction <maximumf>, %16, %cst_10 [2] : vector<4x64x64xf32> to vector<4x64xf32>
    %18 = vector.shape_cast %17 : vector<4x64xf32> to vector<4x64x1xf32>
    %19 = vector.broadcast %18 : vector<4x64x1xf32> to vector<4x64x64xf32>
    %20 = arith.subf %16, %19 : vector<4x64x64xf32>
    %21 = math.exp %20 : vector<4x64x64xf32>
    %cst_11 = arith.constant dense<0.000000e+00> : vector<4x64xf32>
    %22 = vector.multi_reduction <add>, %21, %cst_11 [2] : vector<4x64x64xf32> to vector<4x64xf32>
    %23 = vector.shape_cast %22 : vector<4x64xf32> to vector<4x64x1xf32>
    %24 = tpu.reciprocal %23 {approx = true} : vector<4x64x1xf32> -> vector<4x64x1xf32>
    %25 = vector.broadcast %24 : vector<4x64x1xf32> to vector<4x64x64xf32>
    %26 = arith.mulf %21, %25 : vector<4x64x64xf32>
    %cst_12 = arith.constant dense<0.000000e+00> : vector<4x8x64xf32>
    %27 = tpu.matmul %13, %26, %cst_12 {dimension_numbers = #tpu.dot_dimension_numbers<[2], [2], [1], [1], [0, 0, 0, 1, 1, 1], [0], [0]>} : vector<4x8x64xf32>, vector<4x64x64xf32>, vector<4x8x64xf32> -> vector<4x8x64xf32>
    %28 = vector.shape_cast %27 : vector<4x8x64xf32> to vector<32x64xf32>
    %c0_13 = arith.constant 0 : index
    %c0_14 = arith.constant 0 : index
    %c0_15 = arith.constant 0 : index
    %29 = vector.load %arg5[%c0_13, %c0_14, %c0_15] : memref<1x32x64xf32, #tpu.memory_space<vmem>>, vector<1x32x64xf32>
    %30 = vector.shape_cast %29 : vector<1x32x64xf32> to vector<32x64xf32>
    %31 = vector.shape_cast %28 : vector<32x64xf32> to vector<1x32x64xf32>
    tpu.vector_store %arg5[%c0_13, %c0_14, %c0_15], %31 {strides = array<i32>} : memref<1x32x64xf32, #tpu.memory_space<vmem>>, vector<1x32x64xf32>,
    return
  }
  func.func @transform_0(%arg0: i32) -> (i32, i32, i32) {
    %c0_i32 = arith.constant 0 : i32
    %c0_i32_0 = arith.constant 0 : i32
    %c0_i32_1 = arith.constant 0 : i32
    return %arg0, %c0_i32, %c0_i32_0 : i32, i32, i32
  }
  func.func @transform_1(%arg0: i32) -> (i32, i32) {
    %c0_i32 = arith.constant 0 : i32
    %c0_i32_0 = arith.constant 0 : i32
    %c0_i32_1 = arith.constant 0 : i32
    return %c0_i32, %c0_i32_0 : i32, i32
  }
  func.func @transform_2(%arg0: i32) -> (i32, i32) {
    %c0_i32 = arith.constant 0 : i32
    %c0_i32_0 = arith.constant 0 : i32
    %c0_i32_1 = arith.constant 0 : i32
    return %c0_i32, %c0_i32_0 : i32, i32
  }
  func.func @transform_3(%arg0: i32) -> (i32, i32, i32) {
    %c0_i32 = arith.constant 0 : i32
    %c0_i32_0 = arith.constant 0 : i32
    %c0_i32_1 = arith.constant 0 : i32
    %c0_i32_2 = arith.constant 0 : i32
    return %c0_i32, %c0_i32_0, %c0_i32_1 : i32, i32, i32
  }
  func.func @transform_4(%arg0: i32) -> (i32, i32, i32) {
    %c0_i32 = arith.constant 0 : i32
    %c0_i32_0 = arith.constant 0 : i32
    %c0_i32_1 = arith.constant 0 : i32
    return %arg0, %c0_i32, %c0_i32_0 : i32, i32, i32
  }
}

</mosaic_0001>

<bundles_post_ra>
// kernel: mhsa_pallas.1
= control target key start
LH: loop header
LB: loop body
LE: loop exit
PB: predicated region body
PF: predicated region fallthrough
CT: control target
= control target key end

     0   :  { %s2425_s15 = smov 0   ;;  %s3040_s0 = inlined_call_operand.vmem [shape: f32[2,32,64], index: 0, kind: input, shape index: {}]   ;;  %s3041_s1 = inlined_call_operand.vmem [shape: f32[96,32], index: 1, kind: input, shape index: {}]   ;;  %s3042_s2 = inlined_call_operand.vmem [shape: f32[96,1], index: 2, kind: input, shape index: {}]   ;;  %s3043_s3 = inlined_call_operand.vmem [shape: f32[4,8,64], index: 3, kind: input, shape index: {}]   ;;  %s3044_s4 = inlined_call_operand.vmem [shape: f32[2,32,64], index: 4, kind: output, shape index: {}]  }
   0x1 LB: > { %s1897_s16 = sadd.s32 4294967295, %s2395_s15   ;;  %p1901_p0 = scmp.ge.s32.totalorder %s2395_s15, 1  ;;  %s2395_s15 = sphi %s2425_s15, %s14_s15  }
   0x2   : > { %p162_p1 = scmp.lt.s32.totalorder %s2395_s15, 3 }
   0x4   : > { %p163_p2 = pnand %p1901_p0, %p162_p1 }
   0x5   : > { %p188_p3 = scmp.lt.s32.totalorder (!%p163_p2), %s1897_s16, 1 }
   0x6   : > { %166 = sbr.rel (%p163_p2) target bundleno = 1221 (0x4c5), region = 36 }
   0xb   : > { %v202_v0 = vld [vmem:[%s3041_s1] sm:$0xff]  ;;  %vm290_vm0 = vcmask 261120   ;;  %v2397_v1 = vmov 0   ;;  %s3046_s16 = smov (!%p188_p3, %s1897_s16), 1  ;;  %v215_v4 = vld [vmem:[%s3042_s2 + $0x8] sm:$0xff]  ;;  %v216_v5 = vld [vmem:[%s3042_s2 + $0x10] sm:$0xff] }
   0xc   : > { %2090 = vmatprep.mubr.msk.f32.mxu0 %vm290_vm0, %v202_v0  ;;  %2259 = vset.pattern.permute.xlu0 %v2397_v1  ;;  %v214_v2 = vld [vmem:[%s3042_s2] sm:$0xff]  ;;  %s1988_s23 = sshll.u32 %s3046_s16, 5  ;;  %v217_v9 = vld [vmem:[%s3042_s2 + $0x18] sm:$0xff]  ;;  %v219_v10 = vld [vmem:[%s3042_s2 + $0x28] sm:$0xff]  ;;  %vm484_vm1 = vcmask 130048   ;;  %vm1097_vm2 = vcmask 523264  }
   0xd   : > { %2260 = vset.pattern.permute.xlu1 %v2397_v1  ;;  %232 = vperm.xlu0 %2259, %v214_v2   ;;  %v218_v3 = vld [vmem:[%s3042_s2 + $0x20] sm:$0xff]  ;;  %s192_s28 = scalar_lea.vmem %s3040_s0, %s1988_s23  ;;  %v203_v12 = vld [vmem:[%s3041_s1 + $0x8] sm:$0xff]  ;;  %v204_v13 = vld [vmem:[%s3041_s1 + $0x10] sm:$0xff]  ;;  %vm2399_vm3 = vmmov 0   ;;  %s197_s7 = scalar_lea.vmem %s3044_s4, %s1988_s23 }
   0xe   : > { %252 = vperm.xlu1 %2260, %v218_v3   ;;  %v201_v6 = vld [vmem:[%s192_s28 + $0x18] sm:$0xff]  ;;  %v200_v7 = vld [vmem:[%s192_s28 + $0x10] sm:$0xff]  ;;  %v199_v8 = vld [vmem:[%s192_s28 + $0x8] sm:$0xff] }
   0xf   : > { %2082 = vmatprep.subr.mxu0 %v201_v6  ;;  %v198_v11 = vld [vmem:[%s192_s28] sm:$0xff]  ;;  %v220_v14 = vld [vmem:[%s3042_s2 + $0x30] sm:$0xff]  ;;  %v205_v15 = vld [vmem:[%s3041_s1 + $0x18] sm:$0xff] }
  0x10   : > { %2083 = vmatpush3.msra.mxu0 %v201_v6  ;;  %v206_v16 = vld [vmem:[%s3041_s1 + $0x20] sm:$0xff]  ;;  %v221_v17 = vld [vmem:[%s3042_s2 + $0x38] sm:$0xff]  ;;  %v207_v18 = vld [vmem:[%s3041_s1 + $0x28] sm:$0xff] }
  0x11   : > { %237 = vperm.xlu0 %2259, %v215_v4   ;;  %2084 = vmatprep.subr.mxu0 %v200_v7  ;;  %v208_v19 = vld [vmem:[%s3041_s1 + $0x30] sm:$0xff]  ;;  %v209_v20 = vld [vmem:[%s3041_s1 + $0x38] sm:$0xff]  ;;  %v227_v30 = vld [vmem:[%s3043_s3 + $0x8] sm:$0xff] }
  0x12   : > { %242 = vperm.xlu1 %2260, %v216_v5   ;;  %2085 = vmatpush3.msra.mxu0 %v200_v7  ;;  %v226_v32 = vld [vmem:[%s3043_s3] sm:$0xff]  ;;  %v211_v43 = vld [vmem:[%s3041_s1 + $0x48] sm:$0xff]  ;;  %v212_v46 = vld [vmem:[%s3041_s1 + $0x50] sm:$0xff] }
  0x13   : > { %2086 = vmatprep.subr.mxu0 %v199_v8  ;;  %v210_v42 = vld [vmem:[%s3041_s1 + $0x40] sm:$0xff]  ;;  %v213_v47 = vld [vmem:[%s3041_s1 + $0x58] sm:$0xff]  ;;  %v228_v49 = vld [vmem:[%s3043_s3 + $0x10] sm:$0xff] }
  0x14   : > { %2087 = vmatpush3.msra.mxu0 %v199_v8  ;;  %v229_v48 = vld [vmem:[%s3043_s3 + $0x18] sm:$0xff] }
  0x15   : > { %247 = vperm.xlu0 %2259, %v217_v9   ;;  %2088 = vmatprep.subr.mxu0 %v198_v11 }
  0x16   : > { %257 = vperm.xlu1 %2260, %v219_v10   ;;  %2089 = vmatpush3.msra.mxu0 %v198_v11 }
  0x17   : > { %2091 = vmatmul.mubr.msk.f32.vlgmr.msra.gmra.mxu0 %vm290_vm0, %v203_v12 }
  0x18   : > { %2093 = vmatprep.mubr.msk.f32.mxu0 %vm290_vm0, %v204_v13 }
  0x1a   : > { %262 = vperm.xlu1 %2260, %v220_v14  }
  0x1b   : > { %2094 = vmatmul.mubr.msk.f32.gmra.mxu0 %vm290_vm0, %v205_v15 }
  0x1c   : > { %2096 = vmatprep.mubr.msk.f32.mxu0 %vm290_vm0, %v206_v16 }
  0x1e   : > { %267 = vperm.xlu1 %2260, %v221_v17  }
  0x1f   : > { %2097 = vmatmul.mubr.msk.f32.gmra.mxu0 %vm290_vm0, %v207_v18 }
  0x20   : > { %2099 = vmatprep.mubr.msk.f32.mxu0 %vm290_vm0, %v208_v19 }
  0x23   : > { %2100 = vmatmul.mubr.msk.f32.gmra.mxu0 %vm290_vm0, %v209_v20 }
  0x24   : > { %2102 = vmatprep.mubr.msk.f32.mxu0 %vm290_vm0, %v210_v42 }
  0x27   : > { %2103 = vmatmul.mubr.msk.f32.gmra.mxu0 %vm290_vm0, %v211_v43 }
  0x28   : > { %2105 = vmatprep.mubr.msk.f32.mxu0 %vm290_vm0, %v212_v46 }
  0x2b   : > { %2106 = vmatmul.mubr.msk.f32.gmra.mxu0 %vm290_vm0, %v213_v47 }
  0x88   : > { %v233_v21 = vpop.permute.xlu0 %232 }
  0x89   : > { %v253_v22 = vpop.permute.xlu1 %252 }
  0x8c   : > { %v238_v23 = vpop.permute.xlu0 %237 }
  0x8d   : > { %v243_v27 = vpop.permute.xlu1 %242 }
  0x90   : > { %v248_v44 = vpop.permute.xlu0 %247 }
  0x91   : > { %v258_v35 = vpop.permute.xlu1 %257 }
  0x95   : > { %v263_v39 = vpop.permute.xlu1 %262 }
  0x99   : > { %v268_v50 = vpop.permute.xlu1 %267 }
  0xd7   : > { %v2092_v24 = vpop.f32.mrf.mxu0 }
  0xd8   : > { %v399_v25 = vadd.f32 %v2092_v24, %v238_v23 }
  0xd9   : > { %v393_v26 = vpop.f32.mrf.mxu0 }
  0xda   : > { %v394_v28 = vadd.f32 %v393_v26, %v233_v21  ;;  %614 = vxpose.xlu1.b32.start [1/2] (short) (narrow) %v399_v25, 64 }
  0xdb   : > { %v2095_v29 = vpop.f32.mrf.mxu0 }
  0xdc   : > { %452 = vxpose.xlu0.b32.start [1/2] (short) (narrow) %v394_v28, 64  ;;  %2108 = vmatprep.subr.mxu1 %v394_v28  ;;  %v409_v45 = vadd.f32 %v2095_v29, %v248_v44 }
  0xdd   : > { %v403_v31 = vpop.f32.mrf.mxu0  ;;  %2109 = vmatpush3.msra.mxu1 %v394_v28 }
  0xde   : > { %615 = vxpose.xlu1.b32.end [2/2] (short) (narrow) %v227_v30, 64  ;;  %v404_v33 = vadd.f32 %v403_v31, %v243_v27 }
  0xdf   : > { %v2098_v34 = vpop.f32.mrf.mxu0 }
  0xe0   : > { %453 = vxpose.xlu0.b32.end [2/2] (short) (narrow) %v226_v32, 64  ;;  %2140 = vmatprep.subr.mxu0 %v404_v33  ;;  %v419_v55 = vadd.f32 %v2098_v34, %v258_v35 }
  0xe1   : > { %v413_v36 = vpop.f32.mrf.mxu0  ;;  %2141 = vmatpush3.msra.mxu0 %v404_v33 }
  0xe2   : > { %v414_v37 = vadd.f32 %v413_v36, %v253_v22 }
  0xe3   : > { %v2101_v38 = vpop.f32.mrf.mxu0 }
  0xe4   : > { %2110 = vmatprep.subr.mxu1 %v414_v37  ;;  %v429_v6 = vadd.f32 %v2101_v38, %v268_v50 }
  0xe5   : > { %2111 = vmatpush3.msra.mxu1 %v414_v37  ;;  %v423_v40 = vpop.f32.mrf.mxu0 }
  0xe6   : > { %2124 = vmatprep.subr.mxu1 %v399_v25  ;;  %v424_v41 = vadd.f32 %v423_v40, %v263_v39 }
  0xe8   : > { %2142 = vmatprep.subr.mxu0 %v424_v41 }
  0xe9   : > { %2143 = vmatpush3.msra.mxu0 %v424_v41 }
  0xf7   : > { %936 = vxpose.xlu1.b32.start [1/2] (short) (narrow) %v409_v45, 64 }
  0xf9   : > { %775 = vxpose.xlu0.b32.start [1/2] (short) (narrow) %v404_v33, 64  ;;  %v2581_v33 = vpop.f32.mrf.mxu0 }
  0xfb   : > { %937 = vxpose.xlu1.b32.end [2/2] (short) (narrow) %v229_v48, 64  ;;  %v2587_v36 = vpop.f32.mrf.mxu0 }
  0xfd   : > { %776 = vxpose.xlu0.b32.end [2/2] (short) (narrow) %v228_v49, 64  ;;  %v2595_v40 = vpop.f32.mrf.mxu0 }
  0xff   : > { %v2601_v43 = vpop.f32.mrf.mxu0 }
 0x156   : > { %v630_v51 = vpop.trf.xlu1 }
 0x158   : > { %v468_v52 = vpop.trf.xlu0 }
 0x159   : > { %2112 = vmatprep.mubr.msk.f32.mxu1 %vm484_vm1, %v468_v52 }
 0x15a   : > { %v631_v53 = vpop.trf.xlu1 }
 0x15c   : > { %v469_v54 = vpop.trf.xlu0 }
 0x15d   : > { %2113 = vmatmul.mubr.msk.f32.vlgmr.msra.gmra.mxu1 %vm484_vm1, %v469_v54 }
 0x15e   : > { %2125 = vmatpush3.msra.mxu1 %v399_v25  ;;  %v632_v56 = vpop.trf.xlu1 }
 0x15f   : > { %2126 = vmatprep.subr.mxu1 %v419_v55 }
 0x160   : > { %2127 = vmatpush3.msra.mxu1 %v419_v55  ;;  %v470_v57 = vpop.trf.xlu0 }
 0x161   : > { %2156 = vmatprep.subr.mxu1 %v409_v45  ;;  %2115 = vmatprep.mubr.msk.f32.mxu1 %vm484_vm1, %v470_v57 }
 0x162   : > { %v633_v58 = vpop.trf.xlu1 }
 0x164   : > { %v471_v59 = vpop.trf.xlu0 }
 0x165   : > { %2116 = vmatmul.mubr.msk.f32.gmra.mxu1 %vm484_vm1, %v471_v59 }
 0x166   : > { %v634_v60 = vpop.trf.xlu1 }
 0x168   : > { %v472_v61 = vpop.trf.xlu0 }
 0x169   : > { %2118 = vmatprep.mubr.msk.f32.mxu1 %vm484_vm1, %v472_v61 }
 0x16a   : > { %v635_v62 = vpop.trf.xlu1 }
 0x16c   : > { %v473_v63 = vpop.trf.xlu0 }
 0x16d   : > { %2119 = vmatmul.mubr.msk.f32.gmra.mxu1 %vm484_vm1, %v473_v63 }
 0x16e   : > { %v636_v0 = vpop.trf.xlu1 }
 0x170   : > { %v474_v1 = vpop.trf.xlu0 }
 0x171   : > { %2121 = vmatprep.mubr.msk.f32.mxu1 %vm484_vm1, %v474_v1 }
 0x172   : > { %v637_v2 = vpop.trf.xlu1 }
 0x174   : > { %v475_v3 = vpop.trf.xlu0 }
 0x175   : > { %2122 = vmatmul.mubr.msk.f32.gmra.mxu1 %vm484_vm1, %v475_v3 }
 0x176   : > { %2128 = vmatprep.mubr.msk.f32.mxu1 %vm484_vm1, %v630_v51  ;;  %v952_v4 = vpop.trf.xlu1 }
 0x178   : > { %v791_v5 = vpop.trf.xlu0 }
 0x179   : > { %2129 = vmatmul.mubr.msk.f32.vlgmr.msra.gmra.mxu1 %vm484_vm1, %v631_v53  ;;  %2144 = vmatprep.mubr.msk.f32.mxu0 %vm484_vm1, %v791_v5 }
 0x17a   : > { %2157 = vmatpush3.msra.mxu1 %v409_v45  ;;  %2131 = vmatprep.mubr.msk.f32.mxu1 %vm484_vm1, %v632_v56  ;;  %v953_v7 = vpop.trf.xlu1 }
 0x17b   : > { %2158 = vmatprep.subr.mxu1 %v429_v6 }
 0x17c   : > { %2159 = vmatpush3.msra.mxu1 %v429_v6  ;;  %v792_v8 = vpop.trf.xlu0 }
 0x17d   : > { %2145 = vmatmul.mubr.msk.f32.vlgmr.msra.gmra.mxu0 %vm484_vm1, %v792_v8  ;;  %2132 = vmatmul.mubr.msk.f32.gmra.mxu1 %vm484_vm1, %v633_v58 }
 0x17e   : > { %2134 = vmatprep.mubr.msk.f32.mxu1 %vm484_vm1, %v634_v60  ;;  %v954_v9 = vpop.trf.xlu1 }
 0x180   : > { %v793_v10 = vpop.trf.xlu0 }
 0x181   : > { %2147 = vmatprep.mubr.msk.f32.mxu0 %vm484_vm1, %v793_v10  ;;  %2135 = vmatmul.mubr.msk.f32.gmra.mxu1 %vm484_vm1, %v635_v62 }
 0x182   : > { %2137 = vmatprep.mubr.msk.f32.mxu1 %vm484_vm1, %v636_v0  ;;  %v955_v11 = vpop.trf.xlu1 }
 0x184   : > { %v794_v12 = vpop.trf.xlu0 }
 0x185   : > { %2148 = vmatmul.mubr.msk.f32.gmra.mxu0 %vm484_vm1, %v794_v12  ;;  %2138 = vmatmul.mubr.msk.f32.gmra.mxu1 %vm484_vm1, %v637_v2 }
 0x186   : > { %2160 = vmatprep.mubr.msk.f32.mxu1 %vm484_vm1, %v952_v4  ;;  %v956_v13 = vpop.trf.xlu1 }
 0x188   : > { %v795_v14 = vpop.trf.xlu0 }
 0x189   : > { %2150 = vmatprep.mubr.msk.f32.mxu0 %vm484_vm1, %v795_v14  ;;  %2161 = vmatmul.mubr.msk.f32.vlgmr.msra.gmra.mxu1 %vm484_vm1, %v953_v7 }
 0x18a   : > { %2163 = vmatprep.mubr.msk.f32.mxu1 %vm484_vm1, %v954_v9  ;;  %v957_v15 = vpop.trf.xlu1 }
 0x18c   : > { %v796_v16 = vpop.trf.xlu0 }
 0x18d   : > { %2151 = vmatmul.mubr.msk.f32.gmra.mxu0 %vm484_vm1, %v796_v16  ;;  %2164 = vmatmul.mubr.msk.f32.gmra.mxu1 %vm484_vm1, %v955_v11 }
 0x18e   : > { %2166 = vmatprep.mubr.msk.f32.mxu1 %vm484_vm1, %v956_v13  ;;  %v958_v17 = vpop.trf.xlu1 }
 0x190   : > { %v797_v18 = vpop.trf.xlu0 }
 0x191   : > { %2153 = vmatprep.mubr.msk.f32.mxu0 %vm484_vm1, %v797_v18  ;;  %2167 = vmatmul.mubr.msk.f32.gmra.mxu1 %vm484_vm1, %v957_v15 }
 0x192   : > { %v959_v19 = vpop.trf.xlu1  ;;  %2169 = vmatprep.mubr.msk.f32.mxu1 %vm484_vm1, %v958_v17 }
 0x194   : > { %v798_v20 = vpop.trf.xlu0 }
 0x195   : > { %2154 = vmatmul.mubr.msk.f32.gmra.mxu0 %vm484_vm1, %v798_v20  ;;  %2170 = vmatmul.mubr.msk.f32.gmra.mxu1 %vm484_vm1, %v959_v19 }
 0x21d   : > { %v2557_v21 = vpop.f32.mrf.mxu1 }
 0x21e   : > { %v1101_v22 = vsel %vm1097_vm2, %v2557_v21, -inf }
 0x21f   : > { %1102 = vmax.xlane.f32.xlu1 %v1101_v22  ;;  %v2561_v23 = vpop.f32.mrf.mxu1 }
 0x220   : > { %v1098_v24 = vsel %vm1097_vm2, %v2561_v23, -inf }
 0x223   : > { %1099 = vmax.xlane.f32.xlu1 %v1098_v24 }
 0x225   : > { %v2565_v25 = vpop.f32.mrf.mxu1 }
 0x226   : > { %v1107_v26 = vsel %vm1097_vm2, %v2565_v25, -inf }
 0x227   : > { %1108 = vmax.xlane.f32.xlu1 %v1107_v26  ;;  %v2569_v27 = vpop.f32.mrf.mxu1 }
 0x228   : > { %v1104_v28 = vsel %vm1097_vm2, %v2569_v27, -inf }
 0x22b   : > { %1105 = vmax.xlane.f32.xlu1 %v1104_v28 }
 0x22d   : > { %v2573_v29 = vpop.f32.mrf.mxu1 }
 0x22e   : > { %v1113_v30 = vsel %vm1097_vm2, %v2573_v29, -inf }
 0x22f   : > { %1114 = vmax.xlane.f32.xlu0 %v1113_v30  ;;  %v2577_v31 = vpop.f32.mrf.mxu1 }
 0x230   : > { %v1110_v32 = vsel %vm1097_vm2, %v2577_v31, -inf }
 0x231   : > { %1111 = vmax.xlane.f32.xlu1 %v1110_v32 }
 0x235   : > { %v2583_v34 = vpop.f32.mrf.mxu1 }
 0x236   : > { %v1119_v35 = vsel %vm1097_vm2, %v2583_v34, -inf }
 0x237   : > { %1120 = vmax.xlane.f32.xlu0 %v1119_v35  ;;  %v2589_v37 = vpop.f32.mrf.mxu1 }
 0x238   : > { %v1116_v39 = vsel %vm1097_vm2, %v2589_v37, -inf }
 0x239   : > { %v2591_v38 = vpop.f32.mrf.mxu1 }
 0x23a   : > { %v1125_v41 = vsel %vm1097_vm2, %v2591_v38, -inf }
 0x23b   : > { %1117 = vmax.xlane.f32.xlu0 %v1116_v39  ;;  %v2599_v42 = vpop.f32.mrf.mxu1 }
 0x23c   : > { %v1122_v44 = vsel %vm1097_vm2, %v2599_v42, -inf }
 0x23d   : > { %v2605_v45 = vpop.f32.mrf.mxu1  ;;  %v2607_v46 = vpop.f32.mrf.mxu0 }
 0x23e   : > { %v1131_v47 = vsel %vm1097_vm2, %v2605_v45, -inf  ;;  %v1149_v24 = vsel %vm1097_vm2, %v2607_v46, -inf }
 0x23f   : > { %1126 = vmax.xlane.f32.xlu0 %v1125_v41  ;;  %v2611_v48 = vpop.f32.mrf.mxu1  ;;  %v2613_v49 = vpop.f32.mrf.mxu0 }
 0x240   : > { %v1128_v51 = vsel %vm1097_vm2, %v2611_v48, -inf  ;;  %v1146_v28 = vsel %vm1097_vm2, %v2613_v49, -inf }
 0x241   : > { %v2615_v50 = vpop.f32.mrf.mxu1 }
 0x242   : > { %v1137_v54 = vsel %vm1097_vm2, %v2615_v50, -inf }
 0x243   : > { %1123 = vmax.xlane.f32.xlu0 %v1122_v44  ;;  %v2621_v53 = vpop.f32.mrf.mxu1 }
 0x244   : > { %v1134_v58 = vsel %vm1097_vm2, %v2621_v53, -inf }
 0x245   : > { %v2619_v52 = vpop.f32.mrf.mxu0  ;;  %v2627_v56 = vpop.f32.mrf.mxu1 }
 0x246   : > { %v1143_v5 = vsel %vm1097_vm2, %v2627_v56, -inf  ;;  %v1155_v16 = vsel %vm1097_vm2, %v2619_v52, -inf }
 0x247   : > { %1132 = vmax.xlane.f32.xlu0 %v1131_v47  ;;  %v2625_v55 = vpop.f32.mrf.mxu0  ;;  %v2633_v59 = vpop.f32.mrf.mxu1 }
 0x248   : > { %v1140_v61 = vsel %vm1097_vm2, %v2633_v59, -inf  ;;  %v1152_v19 = vsel %vm1097_vm2, %v2625_v55, -inf }
 0x249   : > { %v2641_v63 = vpop.f32.mrf.mxu1 }
 0x24a   : > { %v1173_v2 = vsel %vm1097_vm2, %v2641_v63, -inf }
 0x24b   : > { %1129 = vmax.xlane.f32.xlu0 %v1128_v51  ;;  %v2649_v3 = vpop.f32.mrf.mxu1 }
 0x24c   : > { %v1170_v6 = vsel %vm1097_vm2, %v2649_v3, -inf }
 0x24d   : > { %v2629_v57 = vpop.f32.mrf.mxu0  ;;  %v2657_v7 = vpop.f32.mrf.mxu1 }
 0x24e   : > { %v1179_v8 = vsel %vm1097_vm2, %v2657_v7, -inf  ;;  %v1161_v10 = vsel %vm1097_vm2, %v2629_v57, -inf }
 0x24f   : > { %1138 = vmax.xlane.f32.xlu0 %v1137_v54  ;;  %v2635_v60 = vpop.f32.mrf.mxu0  ;;  %v2661_v9 = vpop.f32.mrf.mxu1 }
 0x250   : > { %v1176_v11 = vsel %vm1097_vm2, %v2661_v9, -inf  ;;  %v1158_v13 = vsel %vm1097_vm2, %v2635_v60, -inf }
 0x251   : > { %v2667_v12 = vpop.f32.mrf.mxu1 }
 0x252   : > { %v1185_v14 = vsel %vm1097_vm2, %v2667_v12, -inf }
 0x253   : > { %1135 = vmax.xlane.f32.xlu0 %v1134_v58  ;;  %v2673_v15 = vpop.f32.mrf.mxu1 }
 0x254   : > { %v1182_v17 = vsel %vm1097_vm2, %v2673_v15, -inf }
 0x255   : > { %v2639_v62 = vpop.f32.mrf.mxu0  ;;  %v2679_v18 = vpop.f32.mrf.mxu1 }
 0x256   : > { %v1167_v0 = vsel %vm1097_vm2, %v2639_v62, -inf  ;;  %v1191_v20 = vsel %vm1097_vm2, %v2679_v18, -inf }
 0x257   : > { %v2645_v1 = vpop.f32.mrf.mxu0  ;;  %1168 = vmax.xlane.f32.xlu1 %v1167_v0  ;;  %1141 = vmax.xlane.f32.xlu0 %v1140_v61  ;;  %v2685_v22 = vpop.f32.mrf.mxu1 }
 0x258   : > { %v1164_v4 = vsel %vm1097_vm2, %v2645_v1, -inf  ;;  %v1188_v26 = vsel %vm1097_vm2, %v2685_v22, -inf }
 0x25b   : > { %1165 = vmax.xlane.f32.xlu1 %v1164_v4  ;;  %1174 = vmax.xlane.f32.xlu0 %v1173_v2 }
 0x25f   : > { %1144 = vmax.xlane.f32.xlu1 %v1143_v5  ;;  %1171 = vmax.xlane.f32.xlu0 %v1170_v6 }
 0x263   : > { %1162 = vmax.xlane.f32.xlu1 %v1161_v10  ;;  %1180 = vmax.xlane.f32.xlu0 %v1179_v8 }
 0x267   : > { %1159 = vmax.xlane.f32.xlu1 %v1158_v13  ;;  %1177 = vmax.xlane.f32.xlu0 %v1176_v11 }
 0x26b   : > { %1156 = vmax.xlane.f32.xlu1 %v1155_v16  ;;  %1186 = vmax.xlane.f32.xlu0 %v1185_v14 }
 0x26f   : > { %1153 = vmax.xlane.f32.xlu1 %v1152_v19  ;;  %1183 = vmax.xlane.f32.xlu0 %v1182_v17 }
 0x273   : > { %1150 = vmax.xlane.f32.xlu1 %v1149_v24  ;;  %1192 = vmax.xlane.f32.xlu0 %v1191_v20 }
 0x277   : > { %1147 = vmax.xlane.f32.xlu1 %v1146_v28  ;;  %1189 = vmax.xlane.f32.xlu0 %v1188_v26 }
 0x2a8   : > { %v1103_v30 = vpop.xlane.xlu1 %1102 }
 0x2a9   : > { %v1195_v32 = vsub.f32 %v2557_v21, %v1103_v30 }
 0x2ab   : > { %v1228_v35 = vmul.f32 1.442695, %v1195_v32 }
 0x2ac   : > { %v1100_v39 = vpop.xlane.xlu1 %1099 }
 0x2ad   : > { %2261 = vpow2.f32 %v1228_v35  ;;  %v1194_v41 = vsub.f32 %v2561_v23, %v1100_v39 }
 0x2af   : > { %v1226_v44 = vmul.f32 1.442695, %v1194_v41 }
 0x2b0   : > { %v1109_v47 = vpop.xlane.xlu1 %1108 }
 0x2b1   : > { %2263 = vpow2.f32 %v1226_v44  ;;  %v1197_v51 = vsub.f32 %v2565_v25, %v1109_v47 }
 0x2b3   : > { %v1232_v54 = vmul.f32 1.442695, %v1197_v51 }
 0x2b4   : > { %v1106_v58 = vpop.xlane.xlu1 %1105 }
 0x2b5   : > { %2265 = vpow2.f32 %v1232_v54  ;;  %v1196_v61 = vsub.f32 %v2569_v27, %v1106_v58 }
 0x2b7   : > { %v1230_v0 = vmul.f32 1.442695, %v1196_v61 }
 0x2b8   : > { %v2701_v4 = vpop.xlane.xlu0 %1114 }
 0x2b9   : > { %2267 = vpow2.f32 %v1230_v0 }
 0x2ba   : > { %v2697_v2 = vpop.eup %2261  ;;  %v2728_v47 = vpop.xlane.xlu1 %1111 }
 0x2bb   : > { %v1293_v21 = vsel %vm1097_vm2, %v2697_v2, 0.0 }
 0x2bc   : > { %1294 = vadd.xlane.f32.xlu1 %v1293_v21 }
 0x2be   : > { %v2703_v23 = vpop.eup %2263 }
 0x2bf   : > { %v1290_v25 = vsel %vm1097_vm2, %v2703_v23, 0.0 }
 0x2c0   : > { %v2707_v5 = vpop.xlane.xlu0 %1120  ;;  %1291 = vadd.xlane.f32.xlu1 %v1290_v25 }
 0x2c2   : > { %v2709_v6 = vpop.eup %2265 }
 0x2c3   : > { %v1299_v27 = vsel %vm1097_vm2, %v2709_v6, 0.0 }
 0x2c4   : > { %v2713_v8 = vpop.xlane.xlu0 %1117  ;;  %1300 = vadd.xlane.f32.xlu1 %v1299_v27 }
 0x2c6   : > { %v2715_v10 = vpop.eup %2267 }
 0x2c7   : > { %v1296_v11 = vsel %vm1097_vm2, %v2715_v10, 0.0 }
 0x2c8   : > { %v1127_v13 = vpop.xlane.xlu0 %1126  ;;  %1297 = vadd.xlane.f32.xlu1 %v1296_v11 }
 0x2c9   : > { %v1203_v14 = vsub.f32 %v2591_v38, %v1127_v13 }
 0x2cb   : > { %v1244_v16 = vmul.f32 1.442695, %v1203_v14 }
 0x2cc   : > { %v1124_v17 = vpop.xlane.xlu0 %1123 }
 0x2cd   : > { %2269 = vpow2.f32 %v1244_v16  ;;  %v1202_v19 = vsub.f32 %v2599_v42, %v1124_v17 }
 0x2cf   : > { %v1242_v20 = vmul.f32 1.442695, %v1202_v19 }
 0x2d0   : > { %v1133_v24 = vpop.xlane.xlu0 %1132 }
 0x2d1   : > { %2271 = vpow2.f32 %v1242_v20  ;;  %v1205_v26 = vsub.f32 %v2605_v45, %v1133_v24 }
 0x2d3   : > { %v1248_v28 = vmul.f32 1.442695, %v1205_v26 }
 0x2d4   : > { %v1130_v30 = vpop.xlane.xlu0 %1129 }
 0x2d5   : > { %2273 = vpow2.f32 %v1248_v28  ;;  %v1204_v32 = vsub.f32 %v2611_v48, %v1130_v30 }
 0x2d7   : > { %v1246_v35 = vmul.f32 1.442695, %v1204_v32 }
 0x2d8   : > { %v1139_v39 = vpop.xlane.xlu0 %1138 }
 0x2d9   : > { %2275 = vpow2.f32 %v1246_v35  ;;  %v1207_v38 = vsub.f32 %v2615_v50, %v1139_v39 }
 0x2da   : > { %v2724_v41 = vpop.eup %2269 }
 0x2db   : > { %v1252_v44 = vmul.f32 1.442695, %v1207_v38  ;;  %v1317_v42 = vsel %vm1097_vm2, %v2724_v41, 0.0 }
 0x2dc   : > { %v1136_v51 = vpop.xlane.xlu0 %1135  ;;  %1318 = vadd.xlane.f32.xlu0 %v1317_v42 }
 0x2dd   : > { %2277 = vpow2.f32 %v1252_v44  ;;  %v1206_v45 = vsub.f32 %v2621_v53, %v1136_v51 }
 0x2de   : > { %v2731_v54 = vpop.eup %2271 }
 0x2df   : > { %v1250_v48 = vmul.f32 1.442695, %v1206_v45  ;;  %v1314_v58 = vsel %vm1097_vm2, %v2731_v54, 0.0 }
 0x2e0   : > { %v2735_v50 = vpop.xlane.xlu1 %1168  ;;  %v1142_v61 = vpop.xlane.xlu0 %1141  ;;  %1315 = vadd.xlane.f32.xlu0 %v1314_v58  ;;  %v1199_v58 = vsub.f32 %v2573_v29, %v2701_v4 }
 0x2e1   : > { %2279 = vpow2.f32 %v1250_v48  ;;  %v1208_v11 = vsub.f32 %v2633_v59, %v1142_v61 }
 0x2e2   : > { %v2737_v0 = vpop.eup %2273 }
 0x2e3   : > { %v1323_v21 = vsel %vm1097_vm2, %v2737_v0, 0.0  ;;  %v1254_v20 = vmul.f32 1.442695, %v1208_v11 }
 0x2e4   : > { %v2741_v25 = vpop.xlane.xlu1 %1165  ;;  %v2743_v27 = vpop.xlane.xlu0 %1174  ;;  %1324 = vadd.xlane.f32.xlu0 %v1323_v21 }
 0x2e6   : > { %v2745_v53 = vpop.eup %2275 }
 0x2e7   : > { %v1320_v13 = vsel %vm1097_vm2, %v2745_v53, 0.0 }
 0x2e8   : > { %v1145_v14 = vpop.xlane.xlu1 %1144  ;;  %v2750_v16 = vpop.xlane.xlu0 %1171  ;;  %1321 = vadd.xlane.f32.xlu0 %v1320_v13 }
 0x2e9   : > { %v1209_v17 = vsub.f32 %v2627_v56, %v1145_v14 }
 0x2ea   : > { %v2753_v19 = vpop.eup %2277 }
 0x2eb   : > { %v1256_v24 = vmul.f32 1.442695, %v1209_v17  ;;  %v1329_v26 = vsel %vm1097_vm2, %v2753_v19, 0.0 }
 0x2ec   : > { %v1163_v28 = vpop.xlane.xlu1 %1162  ;;  %v1181_v30 = vpop.xlane.xlu0 %1180  ;;  %1330 = vadd.xlane.f32.xlu0 %v1329_v26 }
 0x2ed   : > { %2281 = vpow2.f32 %v1256_v24  ;;  %v1221_v59 = vsub.f32 %v2657_v7, %v1181_v30  ;;  %v1215_v30 = vsub.f32 %v2629_v57, %v1163_v28 }
 0x2ee   : > { %v2758_v32 = vpop.eup %2279  ;;  %2283 = vpow2.f32 %v1254_v20  ;;  %v1236_v20 = vmul.f32 1.442695, %v1199_v58 }
 0x2ef   : > { %v1280_v35 = vmul.f32 1.442695, %v1221_v59  ;;  %v1326_v56 = vsel %vm1097_vm2, %v2758_v32, 0.0 }
 0x2f0   : > { %v1160_v39 = vpop.xlane.xlu1 %1159  ;;  %v1178_v38 = vpop.xlane.xlu0 %1177  ;;  %1327 = vadd.xlane.f32.xlu0 %v1326_v56 }
 0x2f1   : > { %v1220_v44 = vsub.f32 %v2661_v9, %v1178_v38  ;;  %2285 = vpow2.f32 %v1280_v35  ;;  %v1268_v38 = vmul.f32 1.442695, %v1215_v30 }
 0x2f3   : > { %v1278_v42 = vmul.f32 1.442695, %v1220_v44  ;;  %v1214_v44 = vsub.f32 %v2635_v60, %v1160_v39 }
 0x2f4   : > { %v1157_v51 = vpop.xlane.xlu1 %1156  ;;  %v1187_v45 = vpop.xlane.xlu0 %1186 }
 0x2f5   : > { %v1213_v48 = vsub.f32 %v2619_v52, %v1157_v51  ;;  %v1223_v7 = vsub.f32 %v2667_v12, %v1187_v45  ;;  %2287 = vpow2.f32 %v1278_v42  ;;  %v1198_v52 = vsub.f32 %v2577_v31, %v2728_v47 }
 0x2f6   : > { %v1201_v51 = vsub.f32 %v2583_v34, %v2707_v5  ;;  %v1266_v45 = vmul.f32 1.442695, %v1214_v44 }
 0x2f7   : > { %v1264_v61 = vmul.f32 1.442695, %v1213_v48  ;;  %v1284_v21 = vmul.f32 1.442695, %v1223_v7  ;;  %v1200_v7 = vsub.f32 %v2589_v37, %v2713_v8  ;;  %v1217_v37 = vsub.f32 %v2639_v62, %v2735_v50 }
 0x2f8   : > { %v1154_v11 = vpop.xlane.xlu1 %1153  ;;  %v1184_v13 = vpop.xlane.xlu0 %1183  ;;  %v1240_v34 = vmul.f32 1.442695, %v1201_v51  ;;  %v1216_v62 = vsub.f32 %v2645_v1, %v2741_v25  ;;  %v1219_v51 = vsub.f32 %v2641_v63, %v2743_v27 }
 0x2f9   : > { %2289 = vpow2.f32 %v1264_v61  ;;  %v1212_v14 = vsub.f32 %v2625_v55, %v1154_v11  ;;  %v1222_v9 = vsub.f32 %v2673_v15, %v1184_v13  ;;  %v1234_v15 = vmul.f32 1.442695, %v1198_v52 }
 0x2fa   : > { %v2769_v17 = vpop.eup %2281  ;;  %2291 = vpow2.f32 %v1284_v21  ;;  %v1238_v11 = vmul.f32 1.442695, %v1200_v7 }
 0x2fb   : > { %v1262_v12 = vmul.f32 1.442695, %v1212_v14  ;;  %v1282_v24 = vmul.f32 1.442695, %v1222_v9  ;;  %v1335_v29 = vsel %vm1097_vm2, %v2769_v17, 0.0  ;;  %v2775_v4 = vpop.eup %2283 }
 0x2fc   : > { %v1193_v26 = vpop.xlane.xlu0 %1192  ;;  %1336 = vadd.xlane.f32.xlu0 %v1335_v29  ;;  %v1332_v31 = vsel %vm1097_vm2, %v2775_v4, 0.0  ;;  %v2398_v29 = vmov 0.0  }
 0x2fd   : > { %2293 = vpow2.f32 %v1262_v12  ;;  %v1225_v55 = vsub.f32 %v2679_v18, %v1193_v26  ;;  %v1272_v12 = vmul.f32 1.442695, %v1217_v37  ;;  %2191 = vmatprep.subr.mxu1 %v2398_v29  ;;  %2172 = vmatprep.subr.mxu0 %v2398_v29  ;;  %v1270_v26 = vmul.f32 1.442695, %v1216_v62 }
 0x2fe   : > { %2295 = vpow2.f32 %v1236_v20  ;;  %v2781_v47 = vpop.eup %2285  ;;  %2207 = vmatprep.mubr.msk.f32.mxu1 %vm2399_vm3, %v2398_v29  ;;  %2188 = vmatprep.mubr.msk.f32.mxu0 %vm2399_vm3, %v2398_v29 }
 0x2ff   : > { %2297 = vpow2.f32 %v1282_v24  ;;  %v1288_v59 = vmul.f32 1.442695, %v1225_v55  ;;  %v1371_v57 = vsel %vm1097_vm2, %v2781_v47, 0.0 }
 0x300   : > { %1333 = vadd.xlane.f32.xlu0 %v1332_v31  ;;  %v1190_v35 = vpop.xlane.xlu0 %1189  ;;  %2299 = vpow2.f32 %v1234_v15 }
 0x301   : > { %v1224_v56 = vsub.f32 %v2685_v22, %v1190_v35  ;;  %2301 = vpow2.f32 %v1288_v59 }
 0x302   : > { %v2787_v28 = vpop.eup %2287  ;;  %2303 = vpow2.f32 %v1268_v38 }
 0x303   : > { %v1286_v18 = vmul.f32 1.442695, %v1224_v56  ;;  %v1368_v60 = vsel %vm1097_vm2, %v2787_v28, 0.0 }
 0x304   : > { %1372 = vadd.xlane.f32.xlu0 %v1371_v57  ;;  %v223_v57 = vld [vmem:[%s3042_s2 + $0x48] sm:$0xff] }
 0x305   : > { %2305 = vpow2.f32 %v1286_v18 }
 0x306   : > { %v2789_v42 = vpop.eup %2289  ;;  %2307 = vpow2.f32 %v1266_v45  ;;  %v1276_v45 = vmul.f32 1.442695, %v1219_v51 }
 0x307   : > { %v1347_v22 = vsel %vm1097_vm2, %v2789_v42, 0.0  ;;  %v2797_v39 = vpop.eup %2291  ;;  %2309 = vpow2.f32 %v1240_v34  ;;  %v1151_v34 = vpop.xlane.xlu1 %1150 }
 0x308   : > { %1348 = vadd.xlane.f32.xlu1 %v1347_v22  ;;  %1369 = vadd.xlane.f32.xlu0 %v1368_v60  ;;  %v1377_v61 = vsel %vm1097_vm2, %v2797_v39, 0.0  ;;  %2311 = vpow2.f32 %v1238_v11  ;;  %v1218_v22 = vsub.f32 %v2649_v3, %v2750_v16  ;;  %v222_v60 = vld [vmem:[%s3042_s2 + $0x40] sm:$0xff] }
 0x309   : > { %2313 = vpow2.f32 %v1272_v12  ;;  %v225_v12 = vld [vmem:[%s3042_s2 + $0x58] sm:$0xff] }
 0x30a   : > { %v2799_v48 = vpop.eup %2293  ;;  %2315 = vpow2.f32 %v1270_v26  ;;  %v1274_v7 = vmul.f32 1.442695, %v1218_v22 }
 0x30b   : > { %v2803_v58 = vpop.eup %2295  ;;  %v1344_v5 = vsel %vm1097_vm2, %v2799_v48, 0.0  ;;  %2317 = vpow2.f32 %v1276_v45  ;;  %v1148_v11 = vpop.xlane.xlu1 %1147 }
 0x30c   : > { %v2809_v21 = vpop.eup %2297  ;;  %1345 = vadd.xlane.f32.xlu1 %v1344_v5  ;;  %1378 = vadd.xlane.f32.xlu0 %v1377_v61  ;;  %v1305_v8 = vsel %vm1097_vm2, %v2803_v58, 0.0  ;;  %2319 = vpow2.f32 %v1274_v7  ;;  %v1211_v5 = vsub.f32 %v2607_v46, %v1151_v34  ;;  %v1210_v63 = vsub.f32 %v2613_v49, %v1148_v11 }
 0x30d   : > { %v2811_v13 = vpop.eup %2299  ;;  %v1374_v14 = vsel %vm1097_vm2, %v2809_v21, 0.0 }
 0x30e   : > { %v2819_v9 = vpop.eup %2301  ;;  %v1302_v20 = vsel %vm1097_vm2, %v2811_v13, 0.0  ;;  %v1260_v37 = vmul.f32 1.442695, %v1211_v5  ;;  %v1258_v16 = vmul.f32 1.442695, %v1210_v63 }
 0x30f   : > { %v2823_v52 = vpop.eup %2303  ;;  %v1383_v50 = vsel %vm1097_vm2, %v2819_v9, 0.0 }
 0x310   : > { %1306 = vadd.xlane.f32.xlu1 %v1305_v8  ;;  %1375 = vadd.xlane.f32.xlu0 %v1374_v14  ;;  %v1353_v55 = vsel %vm1097_vm2, %v2823_v52, 0.0  ;;  %2321 = vpow2.f32 %v1260_v37 }
 0x311   : > { %2323 = vpow2.f32 %v1258_v16 }
 0x312   : > { %v2829_v24 = vpop.eup %2305 }
 0x313   : > { %v1380_v1 = vsel %vm1097_vm2, %v2829_v24, 0.0  ;;  %v2837_v25 = vpop.eup %2307 }
 0x314   : > { %1303 = vadd.xlane.f32.xlu1 %v1302_v20  ;;  %1384 = vadd.xlane.f32.xlu0 %v1383_v50  ;;  %v1350_v15 = vsel %vm1097_vm2, %v2837_v25, 0.0  ;;  %v2841_v30 = vpop.eup %2309 }
 0x315   : > { %v2843_v59 = vpop.eup %2311  ;;  %v1311_v31 = vsel %vm1097_vm2, %v2841_v30, 0.0 }
 0x316   : > { %v1308_v35 = vsel %vm1097_vm2, %v2843_v59, 0.0  ;;  %v2849_v56 = vpop.eup %2313 }
 0x317   : > { %v1359_v38 = vsel %vm1097_vm2, %v2849_v56, 0.0  ;;  %v2853_v44 = vpop.eup %2315 }
 0x318   : > { %1354 = vadd.xlane.f32.xlu1 %v1353_v55  ;;  %1381 = vadd.xlane.f32.xlu0 %v1380_v1  ;;  %v1356_v18 = vsel %vm1097_vm2, %v2853_v44, 0.0  ;;  %v2872_v61 = vpop.eup %2317  ;;  %v224_v55 = vld [vmem:[%s3042_s2 + $0x50] sm:$0xff] }
 0x319   : > { %v1365_v3 = vsel %vm1097_vm2, %v2872_v61, 0.0  ;;  %v2877_v27 = vpop.eup %2319 }
 0x31a   : > { %v1362_v8 = vsel %vm1097_vm2, %v2877_v27, 0.0 }
 0x31c   : > { %1351 = vadd.xlane.f32.xlu1 %v1350_v15 }
 0x31d   : > { %v2881_v46 = vpop.eup %2321 }
 0x31e   : > { %v1341_v14 = vsel %vm1097_vm2, %v2881_v46, 0.0  ;;  %v2885_v20 = vpop.eup %2323 }
 0x31f   : > { %v1338_v49 = vsel %vm1097_vm2, %v2885_v20, 0.0 }
 0x320   : > { %1312 = vadd.xlane.f32.xlu1 %v1311_v31 }
 0x324   : > { %1309 = vadd.xlane.f32.xlu1 %v1308_v35 }
 0x328   : > { %1360 = vadd.xlane.f32.xlu1 %v1359_v38 }
 0x32c   : > { %1357 = vadd.xlane.f32.xlu1 %v1356_v18 }
 0x32e   : > { %277 = vperm.xlu0 %2259, %v223_v57  }
 0x33d   : > { %272 = vperm.xlu1 %2260, %v222_v60  }
 0x345   : > { %v2895_v15 = vpop.xlane.xlu1 %1294 }
 0x349   : > { %v2897_v35 = vpop.xlane.xlu1 %1291 }
 0x34d   : > { %1366 = vadd.xlane.f32.xlu0 %v1365_v3  ;;  %v2899_v57 = vpop.xlane.xlu1 %1300 }
 0x351   : > { %1363 = vadd.xlane.f32.xlu0 %v1362_v8  ;;  %v2901_v45 = vpop.xlane.xlu1 %1297 }
 0x361   : > { %1342 = vadd.xlane.f32.xlu1 %v1341_v14 }
 0x365   : > { %1339 = vadd.xlane.f32.xlu1 %v1338_v49  ;;  %v1319_v62 = vpop.xlane.xlu0 %1318 }
 0x367   : > { %287 = vperm.xlu0 %2259, %v225_v12  }
 0x369   : > { %v1316_v50 = vpop.xlane.xlu0 %1315 }
 0x36d   : > { %v1325_v26 = vpop.xlane.xlu0 %1324 }
 0x371   : > { %v1322_v1 = vpop.xlane.xlu0 %1321 }
 0x375   : > { %v1331_v31 = vpop.xlane.xlu0 %1330 }
 0x376   : > { %282 = vperm.xlu1 %2260, %v224_v55  }
 0x379   : > { %v1328_v38 = vpop.xlane.xlu0 %1327 }
 0x385   : > { %v1337_v18 = vpop.xlane.xlu0 %1336 }
 0x386   : > { %2325 = vrcp.f32 %v1337_v18 }
 0x389   : > { %v1334_v51 = vpop.xlane.xlu0 %1333 }
 0x38a   : > { %2327 = vrcp.f32 %v1334_v51 }
 0x38b   : > { %2329 = vrcp.f32 %v1331_v31 }
 0x38c   : > { %2331 = vrcp.f32 %v1328_v38 }
 0x38d   : > { %v1373_v22 = vpop.xlane.xlu0 %1372  ;;  %2333 = vrcp.f32 %v1325_v26 }
 0x38e   : > { %2335 = vrcp.f32 %v1322_v1 }
 0x38f   : > { %2337 = vrcp.f32 %v1319_v62 }
 0x390   : > { %2339 = vrcp.f32 %v1316_v50 }
 0x391   : > { %v2903_v60 = vpop.xlane.xlu1 %1348  ;;  %v2905_v7 = vpop.xlane.xlu0 %1369 }
 0x393   : > { %v2326_v34 = vpop.eup %2325 }
 0x394   : > { %v1433_v5 = vmul.f32 %v2326_v34, %v2769_v17 }
 0x395   : > { %v2908_v11 = vpop.xlane.xlu1 %1345  ;;  %v1379_v37 = vpop.xlane.xlu0 %1378 }
 0x396   : > { %2192 = vmatpush3.xpose.msk.msra.mxu1 %vm1097_vm2, %v1433_v5 }
 0x397   : > { %v2328_v63 = vpop.eup %2327  ;;  %2193 = vmatprep.subr.mxu1 %v2398_v29 }
 0x398   : > { %v1432_v3 = vmul.f32 %v2328_v63, %v2775_v4  ;;  %v2330_v16 = vpop.eup %2329 }
 0x399   : > { %v1307_v8 = vpop.xlane.xlu1 %1306  ;;  %v1376_v14 = vpop.xlane.xlu0 %1375  ;;  %v1431_v17 = vmul.f32 %v2330_v16, %v2753_v19 }
 0x39a   : > { %2194 = vmatpush3.xpose.msk.msra.mxu1 %vm1097_vm2, %v1432_v3  ;;  %v2332_v49 = vpop.eup %2331 }
 0x39b   : > { %2195 = vmatprep.subr.mxu1 %v2398_v29  ;;  %v1430_v4 = vmul.f32 %v2332_v49, %v2758_v32  ;;  %v2334_v55 = vpop.eup %2333 }
 0x39c   : > { %v1429_v19 = vmul.f32 %v2334_v55, %v2737_v0  ;;  %v2336_v62 = vpop.eup %2335 }
 0x39d   : > { %v1304_v12 = vpop.xlane.xlu1 %1303  ;;  %v1385_v26 = vpop.xlane.xlu0 %1384  ;;  %v1428_v32 = vmul.f32 %v2336_v62, %v2745_v53 }
 0x39e   : > { %2196 = vmatpush3.xpose.msk.msra.mxu1 %vm1097_vm2, %v1431_v17  ;;  %2341 = vrcp.f32 %v1385_v26  ;;  %v2338_v50 = vpop.eup %2337 }
 0x39f   : > { %2197 = vmatprep.subr.mxu1 %v2398_v29  ;;  %v1427_v0 = vmul.f32 %v2338_v50, %v2724_v41  ;;  %v2340_v51 = vpop.eup %2339 }
 0x3a0   : > { %v1426_v5 = vmul.f32 %v2340_v51, %v2731_v54 }
 0x3a1   : > { %v2919_v1 = vpop.xlane.xlu1 %1354  ;;  %v1382_v31 = vpop.xlane.xlu0 %1381 }
 0x3a2   : > { %2198 = vmatpush3.xpose.msk.msra.mxu1 %vm1097_vm2, %v1430_v4  ;;  %2343 = vrcp.f32 %v1382_v31 }
 0x3a3   : > { %2199 = vmatprep.subr.mxu1 %v2398_v29 }
 0x3a5   : > { %v2924_v38 = vpop.xlane.xlu1 %1351 }
 0x3a6   : > { %2200 = vmatpush3.xpose.msk.msra.mxu1 %vm1097_vm2, %v1429_v19 }
 0x3a7   : > { %2201 = vmatprep.subr.mxu1 %v2398_v29 }
 0x3a9   : > { %v1313_v18 = vpop.xlane.xlu1 %1312  ;;  %v278_v53 = vpop.permute.xlu0 %277 }
 0x3aa   : > { %2345 = vrcp.f32 %v1313_v18  ;;  %2202 = vmatpush3.xpose.msk.msra.mxu1 %vm1097_vm2, %v1428_v32 }
 0x3ab   : > { %2203 = vmatprep.subr.mxu1 %v2398_v29  ;;  %2347 = vrcp.f32 %v1379_v37  ;;  %v2342_v63 = vpop.eup %2341  ;;  %v439_v37 = vadd.f32 %v2581_v33, %v278_v53 }
 0x3ac   : > { %v1449_v41 = vmul.f32 %v2342_v63, %v2819_v9 }
 0x3ad   : > { %v1310_v34 = vpop.xlane.xlu1 %1309 }
 0x3ae   : > { %2349 = vrcp.f32 %v1310_v34  ;;  %2204 = vmatpush3.xpose.msk.msra.mxu1 %vm1097_vm2, %v1427_v0 }
 0x3af   : > { %2351 = vrcp.f32 %v1307_v8  ;;  %2205 = vmatprep.subr.mxu1 %v2398_v29  ;;  %v2344_v3 = vpop.eup %2343 }
 0x3b0   : > { %2353 = vrcp.f32 %v1376_v14 }
 0x3b1   : > { %2355 = vrcp.f32 %v1373_v22  ;;  %v1448_v22 = vmul.f32 %v2344_v3, %v2829_v24 }
 0x3b2   : > { %2206 = vmatpush3.xpose.msk.msra.mxu1 %vm1097_vm2, %v1426_v5  ;;  %2357 = vrcp.f32 %v1304_v12 }
 0x3b3   : > { %2229 = vmatprep.subr.mxu1 %v2398_v29  ;;  %2359 = vrcp.f32 %v2899_v57 }
 0x3b4   : > { %2361 = vrcp.f32 %v2905_v7 }
 0x3b5   : > { %2208 = vmatmul.mubr.msk.f32.vlgmr.msra.gmra.mxu1 %vm1097_vm2, %v439_v37  ;;  %2363 = vrcp.f32 %v2901_v45 }
 0x3b6   : > { %2230 = vmatpush3.xpose.msk.msra.mxu1 %vm1097_vm2, %v1449_v41  ;;  %2245 = vmatprep.mubr.msk.f32.mxu1 %vm2399_vm3, %v2398_v29  ;;  %2365 = vrcp.f32 %v2895_v15 }
 0x3b7   : > { %v2346_v54 = vpop.eup %2345  ;;  %2231 = vmatprep.subr.mxu1 %v2398_v29  ;;  %2367 = vrcp.f32 %v2897_v35 }
 0x3b8   : > { %v1425_v33 = vmul.f32 %v2346_v54, %v2841_v30  ;;  %v2348_v9 = vpop.eup %2347 }
 0x3b9   : > { %v1447_v7 = vmul.f32 %v2348_v9, %v2797_v39  ;;  %v1361_v39 = vpop.xlane.xlu1 %1360 }
 0x3ba   : > { %2173 = vmatpush3.xpose.msk.msra.mxu0 %vm1097_vm2, %v1425_v33  ;;  %2232 = vmatpush3.xpose.msk.msra.mxu1 %vm1097_vm2, %v1448_v22  ;;  %2369 = vrcp.f32 %v1361_v39 }
 0x3bb   : > { %v2350_v16 = vpop.eup %2349  ;;  %2174 = vmatprep.subr.mxu0 %v2398_v29  ;;  %2233 = vmatprep.subr.mxu1 %v2398_v29 }
 0x3bc   : > { %v2352_v8 = vpop.eup %2351  ;;  %v1424_v57 = vmul.f32 %v2350_v16, %v2843_v59 }
 0x3bd   : > { %v2354_v30 = vpop.eup %2353  ;;  %v1423_v14 = vmul.f32 %v2352_v8, %v2803_v58  ;;  %v1358_v35 = vpop.xlane.xlu1 %1357 }
 0x3be   : > { %2175 = vmatpush3.xpose.msk.msra.mxu0 %vm1097_vm2, %v1424_v57  ;;  %2234 = vmatpush3.xpose.msk.msra.mxu1 %vm1097_vm2, %v1447_v7  ;;  %v2356_v24 = vpop.eup %2355  ;;  %v1446_v45 = vmul.f32 %v2354_v30, %v2809_v21  ;;  %2371 = vrcp.f32 %v1358_v35 }
 0x3bf   : > { %2176 = vmatprep.subr.mxu0 %v2398_v29  ;;  %2235 = vmatprep.subr.mxu1 %v2398_v29  ;;  %v2358_v17 = vpop.eup %2357  ;;  %v1445_v15 = vmul.f32 %v2356_v24, %v2781_v47  ;;  %2373 = vrcp.f32 %v2919_v1 }
 0x3c0   : > { %v2360_v59 = vpop.eup %2359  ;;  %v1422_v49 = vmul.f32 %v2358_v17, %v2811_v13  ;;  %2375 = vrcp.f32 %v2924_v38 }
 0x3c1   : > { %v2362_v58 = vpop.eup %2361  ;;  %v1421_v21 = vmul.f32 %v2360_v59, %v2709_v6  ;;  %v273_v4 = vpop.permute.xlu1 %272 }
 0x3c2   : > { %2177 = vmatpush3.xpose.msk.msra.mxu0 %vm1097_vm2, %v1423_v14  ;;  %2236 = vmatpush3.xpose.msk.msra.mxu1 %vm1097_vm2, %v1446_v45  ;;  %v1444_v12 = vmul.f32 %v2362_v58, %v2787_v28  ;;  %v2364_v26 = vpop.eup %2363  ;;  %v434_v62 = vadd.f32 %v2587_v36, %v273_v4 }
 0x3c3   : > { %2178 = vmatprep.subr.mxu0 %v2398_v29  ;;  %2237 = vmatprep.subr.mxu1 %v2398_v29  ;;  %v1420_v47 = vmul.f32 %v2364_v26, %v2715_v10  ;;  %v2366_v13 = vpop.eup %2365 }
 0x3c4   : > { %v1419_v6 = vmul.f32 %v2366_v13, %v2697_v2  ;;  %v2368_v28 = vpop.eup %2367 }
 0x3c5   : > { %v1418_v55 = vmul.f32 %v2368_v28, %v2703_v23 }
 0x3c6   : > { %2179 = vmatpush3.xpose.msk.msra.mxu0 %vm1097_vm2, %v1422_v49  ;;  %2238 = vmatpush3.xpose.msk.msra.mxu1 %vm1097_vm2, %v1445_v15 }
 0x3c7   : > { %2180 = vmatprep.subr.mxu0 %v2398_v29  ;;  %2239 = vmatprep.subr.mxu1 %v2398_v29  ;;  %v2370_v10 = vpop.eup %2369 }
 0x3c8   : > { %v1441_v2 = vmul.f32 %v2370_v10, %v2849_v56 }
 0x3ca   : > { %2181 = vmatpush3.xpose.msk.msra.mxu0 %vm1097_vm2, %v1421_v21  ;;  %2240 = vmatpush3.xpose.msk.msra.mxu1 %vm1097_vm2, %v1444_v12 }
 0x3cb   : > { %2182 = vmatprep.subr.mxu0 %v2398_v29  ;;  %2241 = vmatprep.subr.mxu1 %v2398_v29  ;;  %v2372_v1 = vpop.eup %2371 }
 0x3cc   : > { %v1440_v36 = vmul.f32 %v2372_v1, %v2853_v44  ;;  %v2374_v23 = vpop.eup %2373 }
 0x3cd   : > { %v1439_v56 = vmul.f32 %v2374_v23, %v2823_v52 }
 0x3ce   : > { %2183 = vmatpush3.xpose.msk.msra.mxu0 %vm1097_vm2, %v1420_v47 }
 0x3cf   : > { %2184 = vmatprep.subr.mxu0 %v2398_v29 }
 0x3d2   : > { %2185 = vmatpush3.xpose.msk.msra.mxu0 %vm1097_vm2, %v1419_v6 }
 0x3d3   : > { %2186 = vmatprep.subr.mxu0 %v2398_v29 }
 0x3d6   : > { %2187 = vmatpush3.xpose.msk.msra.mxu0 %vm1097_vm2, %v1418_v55  ;;  %v1367_v19 = vpop.xlane.xlu0 %1366 }
 0x3d7   : > { %2377 = vrcp.f32 %v1367_v19  ;;  %2210 = vmatprep.subr.mxu0 %v2398_v29 }
 0x3d8   : > { %2379 = vrcp.f32 %v2903_v60  ;;  %v2376_v60 = vpop.eup %2375 }
 0x3d9   : > { %2189 = vmatmul.mubr.msk.f32.vlgmr.msra.gmra.mxu0 %vm1097_vm2, %v434_v62  ;;  %v1438_v32 = vmul.f32 %v2376_v60, %v2837_v25 }
 0x3da   : > { %2211 = vmatpush3.xpose.msk.msra.mxu0 %vm1097_vm2, %v1441_v2  ;;  %v1364_v31 = vpop.xlane.xlu0 %1363  ;;  %2226 = vmatprep.mubr.msk.f32.mxu0 %vm2399_vm3, %v2398_v29 }
 0x3db   : > { %2381 = vrcp.f32 %v1364_v31  ;;  %2212 = vmatprep.subr.mxu0 %v2398_v29 }
 0x3dc   : > { %2383 = vrcp.f32 %v2908_v11 }
 0x3de   : > { %2213 = vmatpush3.xpose.msk.msra.mxu0 %vm1097_vm2, %v1440_v36 }
 0x3df   : > { %2214 = vmatprep.subr.mxu0 %v2398_v29 }
 0x3e2   : > { %2215 = vmatpush3.xpose.msk.msra.mxu0 %vm1097_vm2, %v1439_v56  ;;  %v288_v0 = vpop.permute.xlu0 %287 }
 0x3e3   : > { %2216 = vmatprep.subr.mxu0 %v2398_v29 }
 0x3e4   : > { %v2378_v38 = vpop.eup %2377 }
 0x3e5   : > { %v2380_v50 = vpop.eup %2379  ;;  %v1443_v11 = vmul.f32 %v2378_v38, %v2872_v61  ;;  %v449_v61 = vadd.f32 %v2595_v40, %v288_v0 }
 0x3e6   : > { %2217 = vmatpush3.xpose.msk.msra.mxu0 %vm1097_vm2, %v1438_v32  ;;  %v1437_v52 = vmul.f32 %v2380_v50, %v2789_v42 }
 0x3e7   : > { %2242 = vmatpush3.xpose.msk.msra.mxu1 %vm1097_vm2, %v1443_v11  ;;  %2218 = vmatprep.subr.mxu0 %v2398_v29 }
 0x3e8   : > { %v2382_v44 = vpop.eup %2381  ;;  %2243 = vmatprep.subr.mxu1 %v2398_v29 }
 0x3e9   : > { %v2384_v18 = vpop.eup %2383  ;;  %v1442_v51 = vmul.f32 %v2382_v44, %v2877_v27 }
 0x3ea   : > { %2219 = vmatpush3.xpose.msk.msra.mxu0 %vm1097_vm2, %v1437_v52  ;;  %v1343_v25 = vpop.xlane.xlu1 %1342  ;;  %v1436_v34 = vmul.f32 %v2384_v18, %v2799_v48 }
 0x3eb   : > { %2385 = vrcp.f32 %v1343_v25  ;;  %2244 = vmatpush3.xpose.msk.msra.mxu1 %vm1097_vm2, %v1442_v51  ;;  %2220 = vmatprep.subr.mxu0 %v2398_v29 }
 0x3ee   : > { %2221 = vmatpush3.xpose.msk.msra.mxu0 %vm1097_vm2, %v1436_v34  ;;  %v1340_v42 = vpop.xlane.xlu1 %1339  ;;  %2246 = vmatmul.mubr.msk.f32.vlgmr.msra.gmra.mxu1 %vm1097_vm2, %v449_v61 }
 0x3ef   : > { %2387 = vrcp.f32 %v1340_v42  ;;  %2222 = vmatprep.subr.mxu0 %v2398_v29 }
 0x3f2   : > { %v283_v40 = vpop.permute.xlu1 %282 }
 0x3f3   : > { %v444_v63 = vadd.f32 %v2601_v43, %v283_v40 }
 0x3f8   : > { %v2386_v27 = vpop.eup %2385 }
 0x3f9   : > { %v1435_v53 = vmul.f32 %v2386_v27, %v2881_v46 }
 0x3fb   : > { %2223 = vmatpush3.xpose.msk.msra.mxu0 %vm1097_vm2, %v1435_v53 }
 0x3fc   : > { %v2388_v5 = vpop.eup %2387  ;;  %2224 = vmatprep.subr.mxu0 %v2398_v29 }
 0x3fd   : > { %v1434_v48 = vmul.f32 %v2388_v5, %v2885_v20 }
 0x3ff   : > { %2225 = vmatpush3.xpose.msk.msra.mxu0 %vm1097_vm2, %v1434_v48 }
 0x402   : > { %2227 = vmatmul.mubr.msk.f32.vlgmr.msra.gmra.mxu0 %vm1097_vm2, %v444_v63 }
 0x475   : > { %v1640_v46 = vpop.f32.mrf.mxu1 }
 0x476   : > { %1839 = vst.msk [vmem:[%s197_s7 + $0x8] sm:$0xff] %vm1097_vm2, %v1640_v46 }
 0x477   : > { %v2209_v37 = vpop.f32.mrf.mxu1 }
 0x499   : > { %v1543_v41 = vpop.f32.mrf.mxu0 }
 0x49a   : > { %1838 = vst.msk [vmem:[%s197_s7] sm:$0xff] %vm1097_vm2, %v1543_v41 }
 0x49b   : > { %v2190_v29 = vpop.f32.mrf.mxu0 }
 0x4ae   : > { %v1834_v20 = vpop.f32.mrf.mxu1 }
 0x4af   : > { %1841 = vst.msk [vmem:[%s197_s7 + $0x18] sm:$0xff] %vm1097_vm2, %v1834_v20 }
 0x4b0   : > { %v2247_v3 = vpop.f32.mrf.mxu1 }
 0x4c2   : > { %v1737_v43 = vpop.f32.mrf.mxu0 }
 0x4c3   : > { %1840 = vst.msk [vmem:[%s197_s7 + $0x10] sm:$0xff] %vm1097_vm2, %v1737_v43 }
 0x4c4   : > { %v2228_v54 = vpop.f32.mrf.mxu0 }
 0x4c5 PF: > { %s14_s15 = sadd.s32 1, %s2395_s15  }
 0x4c6   : > { %p11_p4 = scmp.ge.s32.totalorder %s14_s15, 4  }
 0x4c8   :  { %13 = sbr.rel (!%p11_p4) target bundleno = 1 (0x1), region = 66 }

</bundles_post_ra>
